<compile_context>
chip_gen: v6e
topology: v6e:2x2x1
jax: 0.10.0
libtpu: 0.0.40
codegen_flags: <defaults>
</compile_context>

<pallas_src>
import functools

import jax
import jax.numpy as jnp
from jax import lax
from jax.experimental import pallas as pl
from jax.experimental.pallas import tpu as pltpu


def _round_up(x, m):
    return (x + m - 1) // m * m


def _cdiv(a, b):
    return (a + b - 1) // b


def _num_tensorcores_per_chip():
    # Best-effort detection of dual-TensorCore chips; default to 1 TC.
    try:
        kind = jax.devices()[0].device_kind.lower()
        if "v7" in kind:
            return 2
    except Exception:
        pass
    return 1


def _rnn_chunk_kernel(x_ref, whhT_ref, hid_ref, *, chunk, seq_len, needs_mask,
                      n_chains):
    """One grid step = one (batch tile, sequence chunk).

    x_ref    : (T, TB, Hp) bf16  pre-projected inputs (emb @ W_ih^T + b_ih + b_hh)
    whhT_ref : (Hp, Hp)    bf16  pre-transposed recurrence weight (zero padded)
    hid_ref  : (TB, Hp)    f32   hidden state; resident output carry across chunks
    """
    s = pl.program_id(1)

    # Reset the carried hidden state at the first sequence chunk of each batch tile.
    @pl.when(s == 0)
    def _():
        hid_ref[...] = jnp.zeros_like(hid_ref)

    bt = hid_ref.shape[0]
    sub = bt // n_chains
    base = s * chunk

    # Split the tile into independent recurrence chains so the EUP tanh of one
    # chain overlaps the MXU matmul of the other (pure latency chain otherwise).
    h_init = tuple(hid_ref[c * sub:(c + 1) * sub, :] for c in range(n_chains))

    def step(t, hs):
        x_t = x_ref[t]                       # (bt, Hp) bf16
        new_hs = []
        for c in range(n_chains):
            h = hs[c]
            rec = jnp.dot(h.astype(whhT_ref.dtype), whhT_ref[...],
                          preferred_element_type=jnp.float32)
            h_new = jnp.tanh(
                x_t[c * sub:(c + 1) * sub, :].astype(jnp.float32) + rec)
            if needs_mask:
                # Padded (time) steps keep the previous hidden state.
                h_new = jnp.where(base + t < seq_len, h_new, h)
            new_hs.append(h_new)
        return tuple(new_hs)

    hs = lax.fori_loop(0, chunk, step, h_init, unroll=True)
    for c in range(n_chains):
        hid_ref[c * sub:(c + 1) * sub, :] = hs[c]


def sentiment_classifier_forward(tokens, params, *, chunk=8):
    """tokens: int32 (S, B).  Returns ((out, preds), (lm_out, classifier_in))."""
    emb, w_ih, w_hh, b_ih, b_hh = (params["emb"], params["w_ih"], params["w_hh"],
                                   params["b_ih"], params["b_hh"])
    w_cls, b_cls, thr = params["w_cls"], params["b_cls"], params["thr"]

    S, B = tokens.shape
    H = w_hh.shape[0]

    Hp = max(_round_up(H, 128), 128)            # lane-aligned hidden width

    # ---- batch tiling: fat tiles (<=256 rows), balanced, >=2 tiles on dual-TC ----
    Bp = max(_round_up(B, 8), 8)
    n_btiles = _cdiv(Bp, 256)
    batch_tile = _round_up(_cdiv(Bp, n_btiles), 8)
    if _num_tensorcores_per_chip() >= 2 and n_btiles < 2 and Bp >= 16:
        batch_tile = _round_up(_cdiv(Bp, 2), 8)

    # ---- sequence chunking: ceil(S/T) chunks + validity mask (no T=1 fallback) ----
    T = max(1, min(chunk, S))

    # ---- VMEM budget (v7x has only 64 MiB physical; keep well under) ----
    def vmem_need(t_, bt_):
        return (Hp * Hp * 2                    # resident bf16 W_hh^T
                + 2 * t_ * bt_ * Hp * 2        # double-buffered bf16 x chunk
                + 2 * bt_ * Hp * 4)            # hidden carry block (f32)

    budget = 40 * 1024 * 1024
    while vmem_need(T, batch_tile) > budget and T > 1:
        T = max(1, T // 2)
    while vmem_need(T, batch_tile) > budget and batch_tile > 8:
        batch_tile = max(8, _round_up(batch_tile // 2, 8))

    n_btiles = _cdiv(Bp, batch_tile)
    Bp = n_btiles * batch_tile
    n_chunks = _cdiv(S, T)
    Tpad = n_chunks * T
    needs_mask = (Tpad != S)
    n_chains = 2 if (batch_tile % 16 == 0) else 1

    # ---- one-time input projection folded into the embedding table (wrapper GEMM) ---
    # emb_proj[v] = emb[v] @ W_ih^T + b_ih + b_hh   -> (ntoken, Hp), zero padded, bf16
    emb_proj = (jnp.dot(emb, w_ih.T, preferred_element_type=jnp.float32)
                + b_ih + b_hh)
    emb_proj = jnp.pad(emb_proj, ((0, 0), (0, Hp - H))).astype(jnp.bfloat16)
    x_proj = jnp.take(emb_proj, tokens, axis=0)                      # (S, B, Hp)
    x_proj = jnp.pad(x_proj, ((0, Tpad - S), (0, Bp - B), (0, 0)))   # (Tpad, Bp, Hp)

    # Pre-transposed, zero-padded, bf16 recurrence weight (padding is exactly zero,
    # so padded lanes stay at tanh(0) = 0).
    whhT = jnp.zeros((Hp, Hp), jnp.float32).at[:H, :H].set(w_hh.T)
    whhT = whhT.astype(jnp.bfloat16)

    kernel = functools.partial(_rnn_chunk_kernel, chunk=T, seq_len=S,
                               needs_mask=needs_mask, n_chains=n_chains)

    hidden = pl.pallas_call(
        kernel,
        out_shape=jax.ShapeDtypeStruct((Bp, Hp), jnp.float32),
        grid_spec=pltpu.PrefetchScalarGridSpec(
            num_scalar_prefetch=0,
            grid=(n_btiles, n_chunks),
            in_specs=[
                pl.BlockSpec((T, batch_tile, Hp), lambda b, s: (s, b, 0)),  # x chunk
                pl.BlockSpec((Hp, Hp), lambda b, s: (0, 0)),                # W_hh^T
            ],
            out_specs=pl.BlockSpec((batch_tile, Hp), lambda b, s: (b, 0)),  # carry
        ),
        compiler_params=pltpu.CompilerParams(
            dimension_semantics=("parallel", "arbitrary"),
            vmem_limit_bytes=int(min(max(vmem_need(T, batch_tile) + (8 << 20),
                                         32 << 20), 56 << 20)),
        ),
    )(x_proj, whhT)

    classifier_in = hidden[:B, :H]

    # BinaryClassifier head + threshold_predictions (trivial; done in the wrapper
    # so the kernel has no lane-sparse (B,1) stores or (1,1) broadcast inputs).
    logits = jnp.dot(classifier_in, w_cls.T,
                     preferred_element_type=jnp.float32) + b_cls
    out = jax.nn.sigmoid(logits).astype(jnp.float32)
    preds = (out > thr).astype(jnp.float32)

    lm_out = None  # get_lm_out=False in the reference configuration
    return (out, preds), (lm_out, classifier_in)


def init_params(key, ntoken, ninp, nhid):
    ks = jax.random.split(key, 4)
    scale = 0.1
    return {
        "emb":   scale * jax.random.normal(ks[0], (ntoken, ninp), jnp.float32),
        "w_ih":  scale * jax.random.normal(ks[1], (nhid, ninp), jnp.float32),
        "w_hh":  scale * jax.random.normal(ks[2], (nhid, nhid), jnp.float32),
        "b_ih":  jnp.zeros((1, nhid), jnp.float32),
        "b_hh":  jnp.zeros((1, nhid), jnp.float32),
        "w_cls": scale * jax.random.normal(ks[3], (1, nhid), jnp.float32),
        "b_cls": jnp.zeros((1, 1), jnp.float32),
        "thr":   jnp.full((1, 1), 0.5, jnp.float32),   # BinaryClassifier.thresholds
    }


def _reference_forward(tokens, params):
    """Pure-JAX f32 reference of the same tanh-RNN + BinaryClassifier head."""
    x = jnp.take(params["emb"], tokens, axis=0)          # (S, B, ninp)

    def step(h, x_t):
        h = jnp.tanh(x_t @ params["w_ih"].T + params["b_ih"]
                     + h @ params["w_hh"].T + params["b_hh"])
        return h, None

    h0 = jnp.zeros((tokens.shape[1], params["w_hh"].shape[0]), jnp.float32)
    hT, _ = lax.scan(step, h0, x)
    probs = jax.nn.sigmoid(hT @ params["w_cls"].T + params["b_cls"])
    return hT, probs


if __name__ == "__main__":
    key = jax.random.PRNGKey(0)
    ntoken, ninp, nhid = 64, 32, 32
    S, B = 8, 8

    pkey, tkey = jax.random.split(key)
    params = init_params(pkey, ntoken, ninp, nhid)
    tokens = jax.random.randint(tkey, (S, B), 0, ntoken, dtype=jnp.int32)

    fwd = jax.jit(sentiment_classifier_forward)
    (out, preds), (lm_out, classifier_in) = fwd(tokens, params)
    jax.block_until_ready((out, preds, classifier_in))

    assert out.shape == (B, 1) and preds.shape == (B, 1)
    assert classifier_in.shape == (B, nhid)
    assert bool(jnp.all((preds == 0.0) | (preds == 1.0)))

    # Loose-tolerance check against the pure-f32 reference (bf16 MXU operands).
    hT_ref, probs_ref = _reference_forward(tokens, params)
    assert float(jnp.max(jnp.abs(classifier_in - hT_ref))) < 5e-2
    assert float(jnp.max(jnp.abs(out - probs_ref))) < 5e-2

    print("KERNEL_OK")
</pallas_src>

<mosaic_0001>
module attributes {stable_mosaic.version = 11 : i64} {
  func.func @_rnn_chunk_kernel(%arg0: i32, %arg1: i32, %arg2: memref<8x8x128xbf16, #tpu.memory_space<vmem>>, %arg3: memref<128x128xbf16, #tpu.memory_space<vmem>>, %arg4: memref<8x128xf32, #tpu.memory_space<vmem>>) attributes {dimension_semantics = [#tpu.dimension_semantics<parallel>, #tpu.dimension_semantics<arbitrary>], iteration_bounds = array<i64: 1, 1>, scalar_prefetch = 0 : i64, scratch_operands = 0 : i64, tpu.core_type = #tpu.core_type<tc>, window_params = [{transform_indices = @transform_0, window_bounds = array<i64: 8, 8, 128>}, {pipeline_mode = #tpu.pipeline_mode<synchronous>, transform_indices = @transform_1, window_bounds = array<i64: 128, 128>}, {transform_indices = @transform_2, window_bounds = array<i64: 8, 128>}]} {
    %c0_i32 = arith.constant 0 : i32
    %0 = arith.cmpi eq, %arg1, %c0_i32 : i32
    %1 = arith.extui %0 : i1 to i32
    %c0_i32_0 = arith.constant 0 : i32
    %2 = arith.cmpi ne, %1, %c0_i32_0 : i32
    scf.if %2 {
      %cst_44 = arith.constant 0.000000e+00 : f32
      %77 = vector.broadcast %cst_44 : f32 to vector<8x128xf32>
      %c0_45 = arith.constant 0 : index
      %c0_46 = arith.constant 0 : index
      %78 = vector.load %arg4[%c0_45, %c0_46] : memref<8x128xf32, #tpu.memory_space<vmem>>, vector<8x128xf32>
      tpu.vector_store %arg4[%c0_45, %c0_46], %77 {strides = array<i32>} : memref<8x128xf32, #tpu.memory_space<vmem>>, vector<8x128xf32>,
    } else {
    }
    %c0 = arith.constant 0 : index
    %c0_1 = arith.constant 0 : index
    %3 = vector.load %arg4[%c0, %c0_1] : memref<8x128xf32, #tpu.memory_space<vmem>>, vector<8x128xf32>
    %c0_i32_2 = arith.constant 0 : i32
    %4 = arith.index_cast %c0_i32_2 : i32 to index
    %c0_3 = arith.constant 0 : index
    %c0_4 = arith.constant 0 : index
    %5 = vector.load %arg2[%4, %c0_3, %c0_4] : memref<8x8x128xbf16, #tpu.memory_space<vmem>>, vector<1x8x128xbf16>
    %6 = vector.shape_cast %5 : vector<1x8x128xbf16> to vector<8x128xbf16>
    %7 = arith.truncf %3 : vector<8x128xf32> to vector<8x128xbf16>
    %c0_5 = arith.constant 0 : index
    %c0_6 = arith.constant 0 : index
    %8 = vector.load %arg3[%c0_5, %c0_6] : memref<128x128xbf16, #tpu.memory_space<vmem>>, vector<128x128xbf16>
    %cst = arith.constant dense<0.000000e+00> : vector<8x128xf32>
    %9 = tpu.matmul %7, %8, %cst {dimension_numbers = #tpu.dot_dimension_numbers<[1], [0], [0], [1], [0, 0, 1, 1], [], []>} : vector<8x128xbf16>, vector<128x128xbf16>, vector<8x128xf32> -> vector<8x128xf32>
    %10 = arith.extf %6 : vector<8x128xbf16> to vector<8x128xf32>
    %11 = arith.addf %10, %9 : vector<8x128xf32>
    %12 = math.tanh %11 : vector<8x128xf32>
    %c1_i32 = arith.constant 1 : i32
    %13 = arith.index_cast %c1_i32 : i32 to index
    %c0_7 = arith.constant 0 : index
    %c0_8 = arith.constant 0 : index
    %14 = vector.load %arg2[%13, %c0_7, %c0_8] : memref<8x8x128xbf16, #tpu.memory_space<vmem>>, vector<1x8x128xbf16>
    %15 = vector.shape_cast %14 : vector<1x8x128xbf16> to vector<8x128xbf16>
    %16 = arith.truncf %12 : vector<8x128xf32> to vector<8x128xbf16>
    %c0_9 = arith.constant 0 : index
    %c0_10 = arith.constant 0 : index
    %17 = vector.load %arg3[%c0_9, %c0_10] : memref<128x128xbf16, #tpu.memory_space<vmem>>, vector<128x128xbf16>
    %cst_11 = arith.constant dense<0.000000e+00> : vector<8x128xf32>
    %18 = tpu.matmul %16, %17, %cst_11 {dimension_numbers = #tpu.dot_dimension_numbers<[1], [0], [0], [1], [0, 0, 1, 1], [], []>} : vector<8x128xbf16>, vector<128x128xbf16>, vector<8x128xf32> -> vector<8x128xf32>
    %19 = arith.extf %15 : vector<8x128xbf16> to vector<8x128xf32>
    %20 = arith.addf %19, %18 : vector<8x128xf32>
    %21 = math.tanh %20 : vector<8x128xf32>
    %c2_i32 = arith.constant 2 : i32
    %22 = arith.index_cast %c2_i32 : i32 to index
    %c0_12 = arith.constant 0 : index
    %c0_13 = arith.constant 0 : index
    %23 = vector.load %arg2[%22, %c0_12, %c0_13] : memref<8x8x128xbf16, #tpu.memory_space<vmem>>, vector<1x8x128xbf16>
    %24 = vector.shape_cast %23 : vector<1x8x128xbf16> to vector<8x128xbf16>
    %25 = arith.truncf %21 : vector<8x128xf32> to vector<8x128xbf16>
    %c0_14 = arith.constant 0 : index
    %c0_15 = arith.constant 0 : index
    %26 = vector.load %arg3[%c0_14, %c0_15] : memref<128x128xbf16, #tpu.memory_space<vmem>>, vector<128x128xbf16>
    %cst_16 = arith.constant dense<0.000000e+00> : vector<8x128xf32>
    %27 = tpu.matmul %25, %26, %cst_16 {dimension_numbers = #tpu.dot_dimension_numbers<[1], [0], [0], [1], [0, 0, 1, 1], [], []>} : vector<8x128xbf16>, vector<128x128xbf16>, vector<8x128xf32> -> vector<8x128xf32>
    %28 = arith.extf %24 : vector<8x128xbf16> to vector<8x128xf32>
    %29 = arith.addf %28, %27 : vector<8x128xf32>
    %30 = math.tanh %29 : vector<8x128xf32>
    %c3_i32 = arith.constant 3 : i32
    %31 = arith.index_cast %c3_i32 : i32 to index
    %c0_17 = arith.constant 0 : index
    %c0_18 = arith.constant 0 : index
    %32 = vector.load %arg2[%31, %c0_17, %c0_18] : memref<8x8x128xbf16, #tpu.memory_space<vmem>>, vector<1x8x128xbf16>
    %33 = vector.shape_cast %32 : vector<1x8x128xbf16> to vector<8x128xbf16>
    %34 = arith.truncf %30 : vector<8x128xf32> to vector<8x128xbf16>
    %c0_19 = arith.constant 0 : index
    %c0_20 = arith.constant 0 : index
    %35 = vector.load %arg3[%c0_19, %c0_20] : memref<128x128xbf16, #tpu.memory_space<vmem>>, vector<128x128xbf16>
    %cst_21 = arith.constant dense<0.000000e+00> : vector<8x128xf32>
    %36 = tpu.matmul %34, %35, %cst_21 {dimension_numbers = #tpu.dot_dimension_numbers<[1], [0], [0], [1], [0, 0, 1, 1], [], []>} : vector<8x128xbf16>, vector<128x128xbf16>, vector<8x128xf32> -> vector<8x128xf32>
    %37 = arith.extf %33 : vector<8x128xbf16> to vector<8x128xf32>
    %38 = arith.addf %37, %36 : vector<8x128xf32>
    %39 = math.tanh %38 : vector<8x128xf32>
    %c4_i32 = arith.constant 4 : i32
    %40 = arith.index_cast %c4_i32 : i32 to index
    %c0_22 = arith.constant 0 : index
    %c0_23 = arith.constant 0 : index
    %41 = vector.load %arg2[%40, %c0_22, %c0_23] : memref<8x8x128xbf16, #tpu.memory_space<vmem>>, vector<1x8x128xbf16>
    %42 = vector.shape_cast %41 : vector<1x8x128xbf16> to vector<8x128xbf16>
    %43 = arith.truncf %39 : vector<8x128xf32> to vector<8x128xbf16>
    %c0_24 = arith.constant 0 : index
    %c0_25 = arith.constant 0 : index
    %44 = vector.load %arg3[%c0_24, %c0_25] : memref<128x128xbf16, #tpu.memory_space<vmem>>, vector<128x128xbf16>
    %cst_26 = arith.constant dense<0.000000e+00> : vector<8x128xf32>
    %45 = tpu.matmul %43, %44, %cst_26 {dimension_numbers = #tpu.dot_dimension_numbers<[1], [0], [0], [1], [0, 0, 1, 1], [], []>} : vector<8x128xbf16>, vector<128x128xbf16>, vector<8x128xf32> -> vector<8x128xf32>
    %46 = arith.extf %42 : vector<8x128xbf16> to vector<8x128xf32>
    %47 = arith.addf %46, %45 : vector<8x128xf32>
    %48 = math.tanh %47 : vector<8x128xf32>
    %c5_i32 = arith.constant 5 : i32
    %49 = arith.index_cast %c5_i32 : i32 to index
    %c0_27 = arith.constant 0 : index
    %c0_28 = arith.constant 0 : index
    %50 = vector.load %arg2[%49, %c0_27, %c0_28] : memref<8x8x128xbf16, #tpu.memory_space<vmem>>, vector<1x8x128xbf16>
    %51 = vector.shape_cast %50 : vector<1x8x128xbf16> to vector<8x128xbf16>
    %52 = arith.truncf %48 : vector<8x128xf32> to vector<8x128xbf16>
    %c0_29 = arith.constant 0 : index
    %c0_30 = arith.constant 0 : index
    %53 = vector.load %arg3[%c0_29, %c0_30] : memref<128x128xbf16, #tpu.memory_space<vmem>>, vector<128x128xbf16>
    %cst_31 = arith.constant dense<0.000000e+00> : vector<8x128xf32>
    %54 = tpu.matmul %52, %53, %cst_31 {dimension_numbers = #tpu.dot_dimension_numbers<[1], [0], [0], [1], [0, 0, 1, 1], [], []>} : vector<8x128xbf16>, vector<128x128xbf16>, vector<8x128xf32> -> vector<8x128xf32>
    %55 = arith.extf %51 : vector<8x128xbf16> to vector<8x128xf32>
    %56 = arith.addf %55, %54 : vector<8x128xf32>
    %57 = math.tanh %56 : vector<8x128xf32>
    %c6_i32 = arith.constant 6 : i32
    %58 = arith.index_cast %c6_i32 : i32 to index
    %c0_32 = arith.constant 0 : index
    %c0_33 = arith.constant 0 : index
    %59 = vector.load %arg2[%58, %c0_32, %c0_33] : memref<8x8x128xbf16, #tpu.memory_space<vmem>>, vector<1x8x128xbf16>
    %60 = vector.shape_cast %59 : vector<1x8x128xbf16> to vector<8x128xbf16>
    %61 = arith.truncf %57 : vector<8x128xf32> to vector<8x128xbf16>
    %c0_34 = arith.constant 0 : index
    %c0_35 = arith.constant 0 : index
    %62 = vector.load %arg3[%c0_34, %c0_35] : memref<128x128xbf16, #tpu.memory_space<vmem>>, vector<128x128xbf16>
    %cst_36 = arith.constant dense<0.000000e+00> : vector<8x128xf32>
    %63 = tpu.matmul %61, %62, %cst_36 {dimension_numbers = #tpu.dot_dimension_numbers<[1], [0], [0], [1], [0, 0, 1, 1], [], []>} : vector<8x128xbf16>, vector<128x128xbf16>, vector<8x128xf32> -> vector<8x128xf32>
    %64 = arith.extf %60 : vector<8x128xbf16> to vector<8x128xf32>
    %65 = arith.addf %64, %63 : vector<8x128xf32>
    %66 = math.tanh %65 : vector<8x128xf32>
    %c7_i32 = arith.constant 7 : i32
    %67 = arith.index_cast %c7_i32 : i32 to index
    %c0_37 = arith.constant 0 : index
    %c0_38 = arith.constant 0 : index
    %68 = vector.load %arg2[%67, %c0_37, %c0_38] : memref<8x8x128xbf16, #tpu.memory_space<vmem>>, vector<1x8x128xbf16>
    %69 = vector.shape_cast %68 : vector<1x8x128xbf16> to vector<8x128xbf16>
    %70 = arith.truncf %66 : vector<8x128xf32> to vector<8x128xbf16>
    %c0_39 = arith.constant 0 : index
    %c0_40 = arith.constant 0 : index
    %71 = vector.load %arg3[%c0_39, %c0_40] : memref<128x128xbf16, #tpu.memory_space<vmem>>, vector<128x128xbf16>
    %cst_41 = arith.constant dense<0.000000e+00> : vector<8x128xf32>
    %72 = tpu.matmul %70, %71, %cst_41 {dimension_numbers = #tpu.dot_dimension_numbers<[1], [0], [0], [1], [0, 0, 1, 1], [], []>} : vector<8x128xbf16>, vector<128x128xbf16>, vector<8x128xf32> -> vector<8x128xf32>
    %73 = arith.extf %69 : vector<8x128xbf16> to vector<8x128xf32>
    %74 = arith.addf %73, %72 : vector<8x128xf32>
    %75 = math.tanh %74 : vector<8x128xf32>
    %c8_i32 = arith.constant 8 : i32
    %c0_42 = arith.constant 0 : index
    %c0_43 = arith.constant 0 : index
    %76 = vector.load %arg4[%c0_42, %c0_43] : memref<8x128xf32, #tpu.memory_space<vmem>>, vector<8x128xf32>
    tpu.vector_store %arg4[%c0_42, %c0_43], %75 {strides = array<i32>} : memref<8x128xf32, #tpu.memory_space<vmem>>, vector<8x128xf32>,
    return
  }
  func.func @transform_0(%arg0: i32, %arg1: i32) -> (i32, i32, i32) {
    %c0_i32 = arith.constant 0 : i32
    %c0_i32_0 = arith.constant 0 : i32
    return %arg1, %arg0, %c0_i32 : i32, i32, i32
  }
  func.func @transform_1(%arg0: i32, %arg1: i32) -> (i32, i32) {
    %c0_i32 = arith.constant 0 : i32
    %c0_i32_0 = arith.constant 0 : i32
    %c0_i32_1 = arith.constant 0 : i32
    return %c0_i32, %c0_i32_0 : i32, i32
  }
  func.func @transform_2(%arg0: i32, %arg1: i32) -> (i32, i32) {
    %c0_i32 = arith.constant 0 : i32
    %c0_i32_0 = arith.constant 0 : i32
    return %arg0, %c0_i32 : i32, i32
  }
}

</mosaic_0001>

<bundles_post_ra>
// kernel: sentiment_classifier_forward.1
= control target key start
LH: loop header
LB: loop body
LE: loop exit
PB: predicated region body
PF: predicated region fallthrough
CT: control target
= control target key end

     0   :  { %v727_v0 = vmov 0.0   ;;  %vm728_vm0 = vmmov 0   ;;  %v729_v9 = vmov 0.0|0.0   ;;  %s944_s1 = inlined_call_operand.vmem [shape: bf16[128,128], index: 1, kind: input, shape index: {}]   ;;  %s945_s0 = inlined_call_operand.vmem [shape: bf16[8,8,128], index: 0, kind: input, shape index: {}]   ;;  %s946_s2 = inlined_call_operand.vmem [shape: f32[8,128], index: 2, kind: output, shape index: {}]  }
   0x1   :  { %541 = vmatprep.subr.bf16.mxu0 %v727_v0  ;;  %v749_v1 = vld [vmem:[%s944_s1 + $0x38] sm:$0xff]   ;;  %557 = vmatprep.mubr.msk.bf16.mxu0 %vm728_vm0, %v727_v0  ;;  %v760_v2 = vld [vmem:[%s944_s1 + $0x30] sm:$0xff]   ;;  %v769_v3 = vld [vmem:[%s944_s1 + $0x28] sm:$0xff]  }
   0x2   :  { %561 = vmatprep.subr.bf16.mxu1 %v727_v0  ;;  %577 = vmatprep.mubr.msk.bf16.mxu1 %vm728_vm0, %v727_v0  ;;  %v778_v4 = vld [vmem:[%s944_s1 + $0x20] sm:$0xff]   ;;  %v787_v5 = vld [vmem:[%s944_s1 + $0x18] sm:$0xff]   ;;  %v796_v6 = vld [vmem:[%s944_s1 + $0x10] sm:$0xff]  }
   0x3   :  { %542 = vmatpush3.bf16.msra.mxu0 %v749_v1  ;;  %562 = vmatpush3.bf16.msra.mxu1 %v749_v1  ;;  %v805_v7 = vld [vmem:[%s944_s1 + $0x8] sm:$0xff]   ;;  %v814_v8 = vld [vmem:[%s944_s1] sm:$0xff]   ;;  %v465_v44 = vld [vmem:[%s945_s0 + $0x10] sm:$0xff]  }
   0x4   :  { %543 = vmatprep.subr.bf16.mxu0 %v727_v0  ;;  %563 = vmatprep.subr.bf16.mxu1 %v727_v0  ;;  %v18_v10 = vld [vmem:[%s945_s0] sm:$0xff]   ;;  %v463_v27 = vld [vmem:[%s945_s0 + $0x8] sm:$0xff]   ;;  %v308_v45 = vunpack.c.l.bf16 %v465_v44  ;;  %v354_v53 = vunpack.c.h.bf16 %v465_v44  ;;  %v467_v61 = vld [vmem:[%s945_s0 + $0x18] sm:$0xff]  }
   0x5   :  { %v124_v11 = vunpack.c.l.bf16 %v18_v10  ;;  %v170_v19 = vunpack.c.h.bf16 %v18_v10  ;;  %v216_v28 = vunpack.c.l.bf16 %v463_v27  ;;  %v262_v36 = vunpack.c.h.bf16 %v463_v27 }
   0x6   :  { %v400_v62 = vunpack.c.l.bf16 %v467_v61 }
   0x7   :  { %544 = vmatpush3.bf16.msra.mxu0 %v760_v2  ;;  %564 = vmatpush3.bf16.msra.mxu1 %v760_v2 }
   0x8   :  { %545 = vmatprep.subr.bf16.mxu0 %v727_v0  ;;  %565 = vmatprep.subr.bf16.mxu1 %v727_v0 }
   0xb   :  { %546 = vmatpush3.bf16.msra.mxu0 %v769_v3  ;;  %566 = vmatpush3.bf16.msra.mxu1 %v769_v3 }
   0xc   :  { %547 = vmatprep.subr.bf16.mxu0 %v727_v0  ;;  %567 = vmatprep.subr.bf16.mxu1 %v727_v0 }
   0xf   :  { %548 = vmatpush3.bf16.msra.mxu0 %v778_v4  ;;  %568 = vmatpush3.bf16.msra.mxu1 %v778_v4 }
  0x10   :  { %549 = vmatprep.subr.bf16.mxu0 %v727_v0  ;;  %569 = vmatprep.subr.bf16.mxu1 %v727_v0 }
  0x13   :  { %550 = vmatpush3.bf16.msra.mxu0 %v787_v5  ;;  %570 = vmatpush3.bf16.msra.mxu1 %v787_v5 }
  0x14   :  { %551 = vmatprep.subr.bf16.mxu0 %v727_v0  ;;  %571 = vmatprep.subr.bf16.mxu1 %v727_v0 }
  0x17   :  { %552 = vmatpush3.bf16.msra.mxu0 %v796_v6  ;;  %572 = vmatpush3.bf16.msra.mxu1 %v796_v6 }
  0x18   :  { %553 = vmatprep.subr.bf16.mxu0 %v727_v0  ;;  %573 = vmatprep.subr.bf16.mxu1 %v727_v0 }
  0x1b   :  { %554 = vmatpush3.bf16.msra.mxu0 %v805_v7  ;;  %574 = vmatpush3.bf16.msra.mxu1 %v805_v7 }
  0x1c   :  { %555 = vmatprep.subr.bf16.mxu0 %v727_v0  ;;  %575 = vmatprep.subr.bf16.mxu1 %v727_v0 }
  0x1f   :  { %556 = vmatpush3.bf16.msra.mxu0 %v814_v8  ;;  %576 = vmatpush3.bf16.msra.mxu1 %v814_v8 }
  0x20   :  { %581 = vmatprep.subr.bf16.mxu0 %v727_v0  ;;  %601 = vmatprep.subr.bf16.mxu1 %v727_v0 }
  0x22   :  { %558 = vmatmul.mubr.bf16.vlgmr.msra.gmra.mxu0 %v729_v9 }
  0x23   :  { %582 = vmatpush3.bf16.msra.mxu0 %v749_v1  ;;  %597 = vmatprep.mubr.msk.bf16.mxu0 %vm728_vm0, %v727_v0 }
  0x24   :  { %583 = vmatprep.subr.bf16.mxu0 %v727_v0 }
  0x27   :  { %584 = vmatpush3.bf16.msra.mxu0 %v760_v2 }
  0x28   :  { %585 = vmatprep.subr.bf16.mxu0 %v727_v0 }
  0x2b   :  { %586 = vmatpush3.bf16.msra.mxu0 %v769_v3 }
  0x2c   :  { %587 = vmatprep.subr.bf16.mxu0 %v727_v0 }
  0x2f   :  { %588 = vmatpush3.bf16.msra.mxu0 %v778_v4 }
  0x30   :  { %589 = vmatprep.subr.bf16.mxu0 %v727_v0 }
  0x33   :  { %590 = vmatpush3.bf16.msra.mxu0 %v787_v5 }
  0x34   :  { %591 = vmatprep.subr.bf16.mxu0 %v727_v0 }
  0x37   :  { %592 = vmatpush3.bf16.msra.mxu0 %v796_v6 }
  0x38   :  { %593 = vmatprep.subr.bf16.mxu0 %v727_v0 }
  0x3b   :  { %594 = vmatpush3.bf16.msra.mxu0 %v805_v7 }
  0x3c   :  { %595 = vmatprep.subr.bf16.mxu0 %v727_v0 }
  0x3f   :  { %596 = vmatpush3.bf16.msra.mxu0 %v814_v8 }
  0x40   :  { %621 = vmatprep.subr.bf16.mxu0 %v727_v0 }
  0xe2   :  { %v118_v12 = vpop.f32.mrf.mxu0 }
  0xe3   :  { %v125_v13 = vadd.f32 %v124_v11, %v118_v12 }
  0xe4   :  { %v559_v14 = vpop.f32.mrf.mxu0 }
  0xe5   :  { %711 = vtanh.f32 %v125_v13 }
  0xe6   :  { %v121_v15 = vpop.f32.mrf.mxu0 }
  0xe8   :  { %v560_v16 = vpop.f32.mrf.mxu0 }
  0xf2   :  { %v712_v17 = vpop.eup %711 }
  0xf3   :  { %v129_v18 = vpack.c.bf16 %v712_v17, %v712_v17 }
  0xf5   :  { %578 = vmatmul.mubr.bf16.vlgmr.msra.gmra.mxu1 %v129_v18 }
  0xf6   :  { %602 = vmatpush3.bf16.msra.mxu1 %v749_v1  ;;  %617 = vmatprep.mubr.msk.bf16.mxu1 %vm728_vm0, %v727_v0 }
  0xf7   :  { %603 = vmatprep.subr.bf16.mxu1 %v727_v0 }
  0xfa   :  { %604 = vmatpush3.bf16.msra.mxu1 %v760_v2 }
  0xfb   :  { %605 = vmatprep.subr.bf16.mxu1 %v727_v0 }
  0xfe   :  { %606 = vmatpush3.bf16.msra.mxu1 %v769_v3 }
  0xff   :  { %607 = vmatprep.subr.bf16.mxu1 %v727_v0 }
 0x102   :  { %608 = vmatpush3.bf16.msra.mxu1 %v778_v4 }
 0x103   :  { %609 = vmatprep.subr.bf16.mxu1 %v727_v0 }
 0x106   :  { %610 = vmatpush3.bf16.msra.mxu1 %v787_v5 }
 0x107   :  { %611 = vmatprep.subr.bf16.mxu1 %v727_v0 }
 0x10a   :  { %612 = vmatpush3.bf16.msra.mxu1 %v796_v6 }
 0x10b   :  { %613 = vmatprep.subr.bf16.mxu1 %v727_v0 }
 0x10e   :  { %614 = vmatpush3.bf16.msra.mxu1 %v805_v7 }
 0x10f   :  { %615 = vmatprep.subr.bf16.mxu1 %v727_v0 }
 0x112   :  { %616 = vmatpush3.bf16.msra.mxu1 %v814_v8 }
 0x113   :  { %641 = vmatprep.subr.bf16.mxu1 %v727_v0 }
 0x1b5   :  { %v164_v20 = vpop.f32.mrf.mxu1 }
 0x1b6   :  { %v171_v21 = vadd.f32 %v170_v19, %v164_v20 }
 0x1b7   :  { %v579_v22 = vpop.f32.mrf.mxu1 }
 0x1b8   :  { %713 = vtanh.f32 %v171_v21 }
 0x1b9   :  { %v167_v23 = vpop.f32.mrf.mxu1 }
 0x1bb   :  { %v580_v24 = vpop.f32.mrf.mxu1 }
 0x1c5   :  { %v714_v25 = vpop.eup %713 }
 0x1c6   :  { %v175_v26 = vpack.c.bf16 %v714_v25, %v714_v25 }
 0x1c8   :  { %598 = vmatmul.mubr.bf16.vlgmr.msra.gmra.mxu0 %v175_v26 }
 0x1c9   :  { %622 = vmatpush3.bf16.msra.mxu0 %v749_v1  ;;  %637 = vmatprep.mubr.msk.bf16.mxu0 %vm728_vm0, %v727_v0 }
 0x1ca   :  { %623 = vmatprep.subr.bf16.mxu0 %v727_v0 }
 0x1cd   :  { %624 = vmatpush3.bf16.msra.mxu0 %v760_v2 }
 0x1ce   :  { %625 = vmatprep.subr.bf16.mxu0 %v727_v0 }
 0x1d1   :  { %626 = vmatpush3.bf16.msra.mxu0 %v769_v3 }
 0x1d2   :  { %627 = vmatprep.subr.bf16.mxu0 %v727_v0 }
 0x1d5   :  { %628 = vmatpush3.bf16.msra.mxu0 %v778_v4 }
 0x1d6   :  { %629 = vmatprep.subr.bf16.mxu0 %v727_v0 }
 0x1d9   :  { %630 = vmatpush3.bf16.msra.mxu0 %v787_v5 }
 0x1da   :  { %631 = vmatprep.subr.bf16.mxu0 %v727_v0 }
 0x1dd   :  { %632 = vmatpush3.bf16.msra.mxu0 %v796_v6 }
 0x1de   :  { %633 = vmatprep.subr.bf16.mxu0 %v727_v0 }
 0x1e1   :  { %634 = vmatpush3.bf16.msra.mxu0 %v805_v7 }
 0x1e2   :  { %635 = vmatprep.subr.bf16.mxu0 %v727_v0 }
 0x1e5   :  { %636 = vmatpush3.bf16.msra.mxu0 %v814_v8 }
 0x1e6   :  { %661 = vmatprep.subr.bf16.mxu0 %v727_v0 }
 0x288   :  { %v210_v29 = vpop.f32.mrf.mxu0 }
 0x289   :  { %v217_v30 = vadd.f32 %v216_v28, %v210_v29 }
 0x28a   :  { %v599_v31 = vpop.f32.mrf.mxu0 }
 0x28b   :  { %715 = vtanh.f32 %v217_v30 }
 0x28c   :  { %v213_v32 = vpop.f32.mrf.mxu0 }
 0x28e   :  { %v600_v33 = vpop.f32.mrf.mxu0 }
 0x298   :  { %v716_v34 = vpop.eup %715 }
 0x299   :  { %v221_v35 = vpack.c.bf16 %v716_v34, %v716_v34 }
 0x29b   :  { %618 = vmatmul.mubr.bf16.vlgmr.msra.gmra.mxu1 %v221_v35 }
 0x29c   :  { %642 = vmatpush3.bf16.msra.mxu1 %v749_v1  ;;  %657 = vmatprep.mubr.msk.bf16.mxu1 %vm728_vm0, %v727_v0 }
 0x29d   :  { %643 = vmatprep.subr.bf16.mxu1 %v727_v0 }
 0x2a0   :  { %644 = vmatpush3.bf16.msra.mxu1 %v760_v2 }
 0x2a1   :  { %645 = vmatprep.subr.bf16.mxu1 %v727_v0 }
 0x2a4   :  { %646 = vmatpush3.bf16.msra.mxu1 %v769_v3 }
 0x2a5   :  { %647 = vmatprep.subr.bf16.mxu1 %v727_v0 }
 0x2a8   :  { %648 = vmatpush3.bf16.msra.mxu1 %v778_v4 }
 0x2a9   :  { %649 = vmatprep.subr.bf16.mxu1 %v727_v0 }
 0x2ac   :  { %650 = vmatpush3.bf16.msra.mxu1 %v787_v5 }
 0x2ad   :  { %651 = vmatprep.subr.bf16.mxu1 %v727_v0 }
 0x2b0   :  { %652 = vmatpush3.bf16.msra.mxu1 %v796_v6 }
 0x2b1   :  { %653 = vmatprep.subr.bf16.mxu1 %v727_v0 }
 0x2b4   :  { %654 = vmatpush3.bf16.msra.mxu1 %v805_v7 }
 0x2b5   :  { %655 = vmatprep.subr.bf16.mxu1 %v727_v0 }
 0x2b8   :  { %656 = vmatpush3.bf16.msra.mxu1 %v814_v8 }
 0x2b9   :  { %681 = vmatprep.subr.bf16.mxu1 %v727_v0 }
 0x35b   :  { %v256_v37 = vpop.f32.mrf.mxu1 }
 0x35c   :  { %v263_v38 = vadd.f32 %v262_v36, %v256_v37 }
 0x35d   :  { %v619_v39 = vpop.f32.mrf.mxu1 }
 0x35e   :  { %717 = vtanh.f32 %v263_v38 }
 0x35f   :  { %v259_v40 = vpop.f32.mrf.mxu1 }
 0x361   :  { %v620_v41 = vpop.f32.mrf.mxu1 }
 0x36b   :  { %v718_v42 = vpop.eup %717 }
 0x36c   :  { %v267_v43 = vpack.c.bf16 %v718_v42, %v718_v42 }
 0x36e   :  { %638 = vmatmul.mubr.bf16.vlgmr.msra.gmra.mxu0 %v267_v43 }
 0x36f   :  { %662 = vmatpush3.bf16.msra.mxu0 %v749_v1  ;;  %677 = vmatprep.mubr.msk.bf16.mxu0 %vm728_vm0, %v727_v0 }
 0x370   :  { %663 = vmatprep.subr.bf16.mxu0 %v727_v0 }
 0x373   :  { %664 = vmatpush3.bf16.msra.mxu0 %v760_v2 }
 0x374   :  { %665 = vmatprep.subr.bf16.mxu0 %v727_v0 }
 0x377   :  { %666 = vmatpush3.bf16.msra.mxu0 %v769_v3 }
 0x378   :  { %667 = vmatprep.subr.bf16.mxu0 %v727_v0 }
 0x37b   :  { %668 = vmatpush3.bf16.msra.mxu0 %v778_v4 }
 0x37c   :  { %669 = vmatprep.subr.bf16.mxu0 %v727_v0 }
 0x37f   :  { %670 = vmatpush3.bf16.msra.mxu0 %v787_v5 }
 0x380   :  { %671 = vmatprep.subr.bf16.mxu0 %v727_v0 }
 0x383   :  { %672 = vmatpush3.bf16.msra.mxu0 %v796_v6 }
 0x384   :  { %673 = vmatprep.subr.bf16.mxu0 %v727_v0 }
 0x387   :  { %674 = vmatpush3.bf16.msra.mxu0 %v805_v7 }
 0x388   :  { %675 = vmatprep.subr.bf16.mxu0 %v727_v0 }
 0x38b   :  { %676 = vmatpush3.bf16.msra.mxu0 %v814_v8 }
 0x42e   :  { %v302_v46 = vpop.f32.mrf.mxu0 }
 0x42f   :  { %v309_v47 = vadd.f32 %v308_v45, %v302_v46 }
 0x430   :  { %v639_v48 = vpop.f32.mrf.mxu0 }
 0x431   :  { %719 = vtanh.f32 %v309_v47 }
 0x432   :  { %v305_v49 = vpop.f32.mrf.mxu0 }
 0x434   :  { %v640_v50 = vpop.f32.mrf.mxu0 }
 0x43e   :  { %v720_v51 = vpop.eup %719 }
 0x43f   :  { %v313_v52 = vpack.c.bf16 %v720_v51, %v720_v51 }
 0x441   :  { %658 = vmatmul.mubr.bf16.vlgmr.msra.gmra.mxu1 %v313_v52 }
 0x442   :  { %682 = vmatpush3.bf16.msra.mxu1 %v749_v1  ;;  %697 = vmatprep.mubr.msk.bf16.mxu1 %vm728_vm0, %v727_v0 }
 0x443   :  { %683 = vmatprep.subr.bf16.mxu1 %v727_v0 }
 0x446   :  { %684 = vmatpush3.bf16.msra.mxu1 %v760_v2 }
 0x447   :  { %685 = vmatprep.subr.bf16.mxu1 %v727_v0 }
 0x44a   :  { %686 = vmatpush3.bf16.msra.mxu1 %v769_v3 }
 0x44b   :  { %687 = vmatprep.subr.bf16.mxu1 %v727_v0 }
 0x44e   :  { %688 = vmatpush3.bf16.msra.mxu1 %v778_v4 }
 0x44f   :  { %689 = vmatprep.subr.bf16.mxu1 %v727_v0 }
 0x452   :  { %690 = vmatpush3.bf16.msra.mxu1 %v787_v5 }
 0x453   :  { %691 = vmatprep.subr.bf16.mxu1 %v727_v0 }
 0x456   :  { %692 = vmatpush3.bf16.msra.mxu1 %v796_v6  ;;  %v446_v6 = vunpack.c.h.bf16 %v467_v61 }
 0x457   :  { %693 = vmatprep.subr.bf16.mxu1 %v727_v0 }
 0x45a   :  { %694 = vmatpush3.bf16.msra.mxu1 %v805_v7 }
 0x45b   :  { %695 = vmatprep.subr.bf16.mxu1 %v727_v0 }
 0x45e   :  { %696 = vmatpush3.bf16.msra.mxu1 %v814_v8 }
 0x501   :  { %v348_v54 = vpop.f32.mrf.mxu1 }
 0x502   :  { %v355_v55 = vadd.f32 %v354_v53, %v348_v54 }
 0x503   :  { %v659_v56 = vpop.f32.mrf.mxu1 }
 0x504   :  { %721 = vtanh.f32 %v355_v55 }
 0x505   :  { %v351_v57 = vpop.f32.mrf.mxu1 }
 0x507   :  { %v660_v58 = vpop.f32.mrf.mxu1 }
 0x511   :  { %v722_v59 = vpop.eup %721 }
 0x512   :  { %v359_v60 = vpack.c.bf16 %v722_v59, %v722_v59 }
 0x514   :  { %678 = vmatmul.mubr.bf16.vlgmr.msra.gmra.mxu0 %v359_v60 }
 0x5d4   :  { %v394_v63 = vpop.f32.mrf.mxu0 }
 0x5d5   :  { %v401_v1 = vadd.f32 %v400_v62, %v394_v63 }
 0x5d6   :  { %v679_v0 = vpop.f32.mrf.mxu0 }
 0x5d7   :  { %723 = vtanh.f32 %v401_v1 }
 0x5d8   :  { %v397_v2 = vpop.f32.mrf.mxu0 }
 0x5da   :  { %v680_v3 = vpop.f32.mrf.mxu0 }
 0x5e4   :  { %v724_v4 = vpop.eup %723 }
 0x5e5   :  { %v405_v5 = vpack.c.bf16 %v724_v4, %v724_v4 }
 0x5e7   :  { %698 = vmatmul.mubr.bf16.vlgmr.msra.gmra.mxu1 %v405_v5 }
 0x6a7   :  { %v440_v7 = vpop.f32.mrf.mxu1 }
 0x6a8   :  { %v447_v8 = vadd.f32 %v446_v6, %v440_v7 }
 0x6a9   :  { %v699_v9 = vpop.f32.mrf.mxu1 }
 0x6aa   :  { %725 = vtanh.f32 %v447_v8 }
 0x6ab   :  { %v443_v10 = vpop.f32.mrf.mxu1 }
 0x6ad   :  { %v700_v11 = vpop.f32.mrf.mxu1 }
 0x6b7   :  { %v726_v12 = vpop.eup %725 }
 0x6b8   :  { %449 = vst [vmem:[%s946_s2] sm:$0xff] %v726_v12 }

</bundles_post_ra>
